<compile_context>
chip_gen: v6e
topology: v6e:2x2x1
jax: 0.10.0
libtpu: 0.0.40
codegen_flags: <defaults>
</compile_context>

<pallas_src>
import functools

import jax
import jax.numpy as jnp
from jax.experimental import pallas as pl
from jax.experimental.pallas import tpu as pltpu


def _round_up(n: int, m: int) -> int:
    return ((n + m - 1) // m) * m


# ----------------------------------------------------------------------------
# Pallas kernel: fused 3-layer conditional MLP (one batch tile per grid step)
# ----------------------------------------------------------------------------
def _discriminator_kernel(x_ref, e_ref,
                          w1x_ref, b1_ref,
                          we_ref,
                          w2h_ref, b2_ref,
                          w3h_ref, b3_ref,
                          o_ref, *, H1, H2, negative_slope, use_leaky):
    def act(h):            # f32 in, f32 out
        if use_leaky:
            return jnp.where(h > 0, h, negative_slope * h)
        return jnp.maximum(h, 0.0)

    x = x_ref[...]          # (TB, x_dim)      bf16
    e = e_ref[...]          # (TB, emb_flat)   bf16

    # Single lane-dense matmul for all three embedding contributions:
    # e @ [W1e | W2e | W3e]  -> (TB, H1 + H2 + OUT), f32 accumulate.
    e_all = jnp.dot(e, we_ref[...], preferred_element_type=jnp.float32)

    # Layer 1: proj1(cat(x, e)) -> activation
    h1 = jnp.dot(x, w1x_ref[...], preferred_element_type=jnp.float32)
    h1 = act(h1 + e_all[:, :H1] + b1_ref[...]).astype(x.dtype)

    # Layer 2: proj2(cat(h1, e)) -> activation
    h2 = jnp.dot(h1, w2h_ref[...], preferred_element_type=jnp.float32)
    h2 = act(h2 + e_all[:, H1:H1 + H2] + b2_ref[...]).astype(x.dtype)

    # Output layer: proj_output(cat(h2, e))  (no activation, padded to 128 lanes)
    out = jnp.dot(h2, w3h_ref[...], preferred_element_type=jnp.float32)
    out = out + e_all[:, H1 + H2:] + b3_ref[...]

    o_ref[...] = out.astype(o_ref.dtype)


# ----------------------------------------------------------------------------
# Parameter construction (matches the shapes in the PyTorch __init__)
# ----------------------------------------------------------------------------
def init_params(key, x_dim, embedd_dim, hidden_dim1, hidden_dim2, output_dim,
                vocab_size):
    emb_flat = embedd_dim * vocab_size
    input_dim = x_dim + emb_flat
    ks = jax.random.split(key, 7)

    def lin(k, fan_in, fan_out):
        scale = 1.0 / jnp.sqrt(fan_in)
        return jax.random.uniform(k, (fan_in, fan_out), jnp.float32,
                                  minval=-scale, maxval=scale)

    def bias(k, fan_in, fan_out):
        scale = 1.0 / jnp.sqrt(fan_in)
        return jax.random.uniform(k, (1, fan_out), jnp.float32,
                                  minval=-scale, maxval=scale)

    return {
        # nn.Embedding(vocab_size, embedd_dim)
        "embedding": jax.random.normal(ks[0], (vocab_size, embedd_dim),
                                       jnp.float32),
        # proj1: Linear(input_dim, hidden_dim1)
        "w1": lin(ks[1], input_dim, hidden_dim1),
        "b1": bias(ks[2], input_dim, hidden_dim1),
        # proj2: Linear(hidden_dim1 + emb_flat, hidden_dim2)
        "w2": lin(ks[3], hidden_dim1 + emb_flat, hidden_dim2),
        "b2": bias(ks[4], hidden_dim1 + emb_flat, hidden_dim2),
        # proj_output: Linear(hidden_dim2 + emb_flat, output_dim)
        "w3": lin(ks[5], hidden_dim2 + emb_flat, output_dim),
        "b3": bias(ks[6], hidden_dim2 + emb_flat, output_dim),
    }
    # TODO(synk): spectral_norm (training-time weight reparameterization) is
    # not modelled; with spectral_norm=False the layers are plain Linears.


# ----------------------------------------------------------------------------
# One-time weight preparation: split, zero-pad to lane multiples, fuse the
# three embedding-side weight blocks, cast to bf16.  Done at init, NOT per call.
# ----------------------------------------------------------------------------
def prepare_params(params, *, x_dim, embedd_dim, vocab_size, hidden_dim1,
                   hidden_dim2, output_dim, compute_dtype=jnp.bfloat16):
    H1 = _round_up(hidden_dim1, 128)
    H2 = _round_up(hidden_dim2, 128)
    OUT = _round_up(output_dim, 128)

    def pad_cols(w, n_to):
        return jnp.pad(w, ((0, 0), (0, n_to - w.shape[1])))

    def pad_rows(w, n_to):
        return jnp.pad(w, ((0, n_to - w.shape[0]), (0, 0)))

    w1, w2, w3 = params["w1"], params["w2"], params["w3"]

    w1x = pad_cols(w1[:x_dim], H1)                              # (x_dim, H1)
    w1e = pad_cols(w1[x_dim:], H1)                              # (emb_flat, H1)
    w2h = pad_cols(pad_rows(w2[:hidden_dim1], H1), H2)          # (H1, H2)
    w2e = pad_cols(w2[hidden_dim1:], H2)                        # (emb_flat, H2)
    w3h = pad_cols(pad_rows(w3[:hidden_dim2], H2), OUT)         # (H2, OUT)
    w3e = pad_cols(w3[hidden_dim2:], OUT)                       # (emb_flat, OUT)

    we = jnp.concatenate([w1e, w2e, w3e], axis=1)               # (emb_flat, H1+H2+OUT)

    return {
        "embedding": params["embedding"],                       # gather stays f32
        "w1x": w1x.astype(compute_dtype),
        "we": we.astype(compute_dtype),
        "w2h": w2h.astype(compute_dtype),
        "w3h": w3h.astype(compute_dtype),
        "b1": pad_cols(params["b1"], H1).astype(jnp.float32),
        "b2": pad_cols(params["b2"], H2).astype(jnp.float32),
        "b3": pad_cols(params["b3"], OUT).astype(jnp.float32),
    }


# ----------------------------------------------------------------------------
# Forward wrapper (glue in plain JAX: argmax / embedding lookup / batch pad)
# ----------------------------------------------------------------------------
def discriminator_forward(prepared, x, y, *, x_dim, embedd_dim, vocab_size,
                          hidden_dim1, hidden_dim2, output_dim,
                          activation_func="relu", negative_slope=0.1,
                          tile_b=256):
    emb_flat = embedd_dim * vocab_size
    H1 = _round_up(hidden_dim1, 128)
    H2 = _round_up(hidden_dim2, 128)
    OUT = _round_up(output_dim, 128)

    # glue: y = argmax(y, 1) if y.ndim > 1 else y.long(); embedding; flatten
    y_idx = jnp.argmax(y, axis=1) if y.ndim > 1 else y.astype(jnp.int32)
    y_emb = jnp.take(prepared["embedding"], y_idx, axis=0)
    e = y_emb.reshape(y_emb.shape[0], -1)                 # (B, emb_flat)

    B = x.shape[0]
    TILE_B = tile_b if B >= tile_b else _round_up(max(B, 1), 8)
    B_pad = _round_up(B, TILE_B)

    compute_dtype = prepared["w1x"].dtype
    x_c = x.astype(compute_dtype)
    e_c = e.astype(compute_dtype)
    if B_pad != B:
        x_c = jnp.pad(x_c, ((0, B_pad - B), (0, 0)))
        e_c = jnp.pad(e_c, ((0, B_pad - B), (0, 0)))

    grid = (B_pad // TILE_B,)

    tile_map = lambda i: (i, 0)      # batch-tiled operands
    const_map = lambda i: (0, 0)     # weights / biases stay resident in VMEM

    in_specs = [
        pl.BlockSpec((TILE_B, x_dim), tile_map),
        pl.BlockSpec((TILE_B, emb_flat), tile_map),
        pl.BlockSpec((x_dim, H1), const_map),
        pl.BlockSpec((1, H1), const_map),
        pl.BlockSpec((emb_flat, H1 + H2 + OUT), const_map),
        pl.BlockSpec((H1, H2), const_map),
        pl.BlockSpec((1, H2), const_map),
        pl.BlockSpec((H2, OUT), const_map),
        pl.BlockSpec((1, OUT), const_map),
    ]
    out_specs = pl.BlockSpec((TILE_B, OUT), tile_map)

    # Cost / VMEM budget (bf16 weights+inputs, f32 biases+output).
    weight_bytes = (2 * (x_dim * H1 + emb_flat * (H1 + H2 + OUT)
                         + H1 * H2 + H2 * OUT)
                    + 4 * (H1 + H2 + OUT))
    tile_io_bytes = 2 * TILE_B * (x_dim + emb_flat) + 4 * TILE_B * OUT
    scratch_bytes = 4 * TILE_B * (H1 + H2 + OUT) * 3
    vmem_limit = int(1.5 * (2 * weight_bytes + 2 * tile_io_bytes
                            + scratch_bytes)) + (8 << 20)
    vmem_limit = max(32 << 20, min(vmem_limit, 100 << 20))

    flops = 2 * B_pad * (x_dim * H1 + emb_flat * (H1 + H2 + OUT)
                         + H1 * H2 + H2 * OUT)
    bytes_accessed = weight_bytes + B_pad * (2 * (x_dim + emb_flat) + 4 * OUT)

    kernel = functools.partial(
        _discriminator_kernel,
        H1=H1, H2=H2,
        negative_slope=negative_slope,
        use_leaky=(activation_func.lower() == "leaky_relu"),
    )

    out_padded = pl.pallas_call(
        kernel,
        out_shape=jax.ShapeDtypeStruct((B_pad, OUT), jnp.float32),
        grid=grid,
        in_specs=in_specs,
        out_specs=out_specs,
        compiler_params=pltpu.CompilerParams(
            dimension_semantics=("parallel",),
            vmem_limit_bytes=vmem_limit),
        cost_estimate=pl.CostEstimate(flops=flops, transcendentals=0,
                                      bytes_accessed=bytes_accessed),
    )(x_c, e_c,
      prepared["w1x"], prepared["b1"],
      prepared["we"],
      prepared["w2h"], prepared["b2"],
      prepared["w3h"], prepared["b3"])

    return out_padded[:B, :output_dim]


# ----------------------------------------------------------------------------
# Pure-JAX references (mirror the PyTorch forward) for verification
# ----------------------------------------------------------------------------
def discriminator_reference(params, x, y, *, activation_func="relu",
                            negative_slope=0.1, compute_dtype=jnp.float32):
    y_idx = jnp.argmax(y, axis=1) if y.ndim > 1 else y.astype(jnp.int32)
    y_emb = jnp.take(params["embedding"], y_idx, axis=0)
    e = y_emb.reshape(y_emb.shape[0], -1)

    def act(h):
        if activation_func.lower() == "leaky_relu":
            return jnp.where(h > 0, h, negative_slope * h)
        return jnp.maximum(h, 0.0)

    def lin(inp, w, b):
        return jnp.dot(inp.astype(compute_dtype), w.astype(compute_dtype),
                       preferred_element_type=jnp.float32) + b

    h = act(lin(jnp.concatenate([x, e], 1), params["w1"], params["b1"]))
    h = h.astype(compute_dtype)
    h = act(lin(jnp.concatenate([h, e.astype(compute_dtype)], 1),
                params["w2"], params["b2"]))
    h = h.astype(compute_dtype)
    out = lin(jnp.concatenate([h, e.astype(compute_dtype)], 1),
              params["w3"], params["b3"])
    return out


if __name__ == "__main__":
    # small, shape-consistent config: y is (B, num_classes, vocab_size);
    # argmax over dim 1 gives vocab_size indices per row, so the flattened
    # embedding has size embedd_dim * vocab_size (as in the PyTorch module).
    B = 2
    x_dim = 32
    embedd_dim = 4
    vocab_size = 4
    hidden_dim1 = 64
    hidden_dim2 = 32
    output_dim = 1

    key = jax.random.PRNGKey(0)
    k_params, k_x, k_y = jax.random.split(key, 3)

    params = init_params(k_params, x_dim, embedd_dim, hidden_dim1, hidden_dim2,
                         output_dim, vocab_size)
    prepared = prepare_params(
        params, x_dim=x_dim, embedd_dim=embedd_dim, vocab_size=vocab_size,
        hidden_dim1=hidden_dim1, hidden_dim2=hidden_dim2,
        output_dim=output_dim)

    x = jax.random.normal(k_x, (B, x_dim), jnp.float32)
    y = jax.random.uniform(k_y, (B, vocab_size, vocab_size), jnp.float32)

    out = discriminator_forward(
        prepared, x, y,
        x_dim=x_dim, embedd_dim=embedd_dim, vocab_size=vocab_size,
        hidden_dim1=hidden_dim1, hidden_dim2=hidden_dim2,
        output_dim=output_dim, activation_func="relu", negative_slope=0.1,
    )
    out = jax.block_until_ready(out)

    # bf16-matched reference (tight tolerance) and full-f32 reference (loose).
    ref_bf16 = discriminator_reference(params, x, y,
                                       compute_dtype=jnp.bfloat16)
    ref_f32 = discriminator_reference(params, x, y,
                                      compute_dtype=jnp.float32)

    assert out.shape == (B, output_dim)
    assert jnp.allclose(out, ref_bf16, atol=5e-3, rtol=5e-3), (out, ref_bf16)
    assert jnp.allclose(out, ref_f32, atol=5e-2, rtol=5e-2), (out, ref_f32)

    print("KERNEL_OK")
</pallas_src>

<mosaic_0001>
module attributes {stable_mosaic.version = 11 : i64} {
  func.func @_discriminator_kernel(%arg0: i32, %arg1: memref<8x32xbf16, #tpu.memory_space<vmem>>, %arg2: memref<8x16xbf16, #tpu.memory_space<vmem>>, %arg3: memref<32x128xbf16, #tpu.memory_space<vmem>>, %arg4: memref<1x128xf32, #tpu.memory_space<vmem>>, %arg5: memref<16x384xbf16, #tpu.memory_space<vmem>>, %arg6: memref<128x128xbf16, #tpu.memory_space<vmem>>, %arg7: memref<1x128xf32, #tpu.memory_space<vmem>>, %arg8: memref<128x128xbf16, #tpu.memory_space<vmem>>, %arg9: memref<1x128xf32, #tpu.memory_space<vmem>>, %arg10: memref<8x128xf32, #tpu.memory_space<vmem>>) attributes {dimension_semantics = [#tpu.dimension_semantics<parallel>], iteration_bounds = array<i64: 1>, scalar_prefetch = 0 : i64, scratch_operands = 0 : i64, tpu.core_type = #tpu.core_type<tc>, window_params = [{transform_indices = @transform_0, window_bounds = array<i64: 8, 32>}, {transform_indices = @transform_1, window_bounds = array<i64: 8, 16>}, {pipeline_mode = #tpu.pipeline_mode<synchronous>, transform_indices = @transform_2, window_bounds = array<i64: 32, 128>}, {pipeline_mode = #tpu.pipeline_mode<synchronous>, transform_indices = @transform_3, window_bounds = array<i64: 1, 128>}, {pipeline_mode = #tpu.pipeline_mode<synchronous>, transform_indices = @transform_4, window_bounds = array<i64: 16, 384>}, {pipeline_mode = #tpu.pipeline_mode<synchronous>, transform_indices = @transform_5, window_bounds = array<i64: 128, 128>}, {pipeline_mode = #tpu.pipeline_mode<synchronous>, transform_indices = @transform_6, window_bounds = array<i64: 1, 128>}, {pipeline_mode = #tpu.pipeline_mode<synchronous>, transform_indices = @transform_7, window_bounds = array<i64: 128, 128>}, {pipeline_mode = #tpu.pipeline_mode<synchronous>, transform_indices = @transform_8, window_bounds = array<i64: 1, 128>}, {transform_indices = @transform_9, window_bounds = array<i64: 8, 128>}]} {
    %c0 = arith.constant 0 : index
    %c0_0 = arith.constant 0 : index
    %0 = vector.load %arg1[%c0, %c0_0] : memref<8x32xbf16, #tpu.memory_space<vmem>>, vector<8x32xbf16>
    %c0_1 = arith.constant 0 : index
    %c0_2 = arith.constant 0 : index
    %1 = vector.load %arg2[%c0_1, %c0_2] : memref<8x16xbf16, #tpu.memory_space<vmem>>, vector<8x16xbf16>
    %c0_3 = arith.constant 0 : index
    %c0_4 = arith.constant 0 : index
    %2 = vector.load %arg5[%c0_3, %c0_4] : memref<16x384xbf16, #tpu.memory_space<vmem>>, vector<16x384xbf16>
    %cst = arith.constant dense<0.000000e+00> : vector<8x384xf32>
    %3 = tpu.matmul %1, %2, %cst {dimension_numbers = #tpu.dot_dimension_numbers<[1], [0], [0], [1], [0, 0, 1, 1], [], []>} : vector<8x16xbf16>, vector<16x384xbf16>, vector<8x384xf32> -> vector<8x384xf32>
    %c0_5 = arith.constant 0 : index
    %c0_6 = arith.constant 0 : index
    %4 = vector.load %arg3[%c0_5, %c0_6] : memref<32x128xbf16, #tpu.memory_space<vmem>>, vector<32x128xbf16>
    %cst_7 = arith.constant dense<0.000000e+00> : vector<8x128xf32>
    %5 = tpu.matmul %0, %4, %cst_7 {dimension_numbers = #tpu.dot_dimension_numbers<[1], [0], [0], [1], [0, 0, 1, 1], [], []>} : vector<8x32xbf16>, vector<32x128xbf16>, vector<8x128xf32> -> vector<8x128xf32>
    %6 = vector.extract_strided_slice %3 {offsets = [0, 0], sizes = [8, 128], strides = [1, 1]} : vector<8x384xf32> to vector<8x128xf32>
    %7 = arith.addf %5, %6 : vector<8x128xf32>
    %c0_8 = arith.constant 0 : index
    %c0_9 = arith.constant 0 : index
    %8 = vector.load %arg4[%c0_8, %c0_9] : memref<1x128xf32, #tpu.memory_space<vmem>>, vector<1x128xf32>
    %9 = vector.broadcast %8 : vector<1x128xf32> to vector<8x128xf32>
    %10 = arith.addf %7, %9 : vector<8x128xf32>
    %cst_10 = arith.constant 0.000000e+00 : f32
    %11 = vector.broadcast %cst_10 : f32 to vector<8x128xf32>
    %12 = arith.maximumf %10, %11 : vector<8x128xf32>
    %13 = arith.truncf %12 : vector<8x128xf32> to vector<8x128xbf16>
    %c0_11 = arith.constant 0 : index
    %c0_12 = arith.constant 0 : index
    %14 = vector.load %arg6[%c0_11, %c0_12] : memref<128x128xbf16, #tpu.memory_space<vmem>>, vector<128x128xbf16>
    %cst_13 = arith.constant dense<0.000000e+00> : vector<8x128xf32>
    %15 = tpu.matmul %13, %14, %cst_13 {dimension_numbers = #tpu.dot_dimension_numbers<[1], [0], [0], [1], [0, 0, 1, 1], [], []>} : vector<8x128xbf16>, vector<128x128xbf16>, vector<8x128xf32> -> vector<8x128xf32>
    %16 = vector.extract_strided_slice %3 {offsets = [0, 128], sizes = [8, 128], strides = [1, 1]} : vector<8x384xf32> to vector<8x128xf32>
    %17 = arith.addf %15, %16 : vector<8x128xf32>
    %c0_14 = arith.constant 0 : index
    %c0_15 = arith.constant 0 : index
    %18 = vector.load %arg7[%c0_14, %c0_15] : memref<1x128xf32, #tpu.memory_space<vmem>>, vector<1x128xf32>
    %19 = vector.broadcast %18 : vector<1x128xf32> to vector<8x128xf32>
    %20 = arith.addf %17, %19 : vector<8x128xf32>
    %cst_16 = arith.constant 0.000000e+00 : f32
    %21 = vector.broadcast %cst_16 : f32 to vector<8x128xf32>
    %22 = arith.maximumf %20, %21 : vector<8x128xf32>
    %23 = arith.truncf %22 : vector<8x128xf32> to vector<8x128xbf16>
    %c0_17 = arith.constant 0 : index
    %c0_18 = arith.constant 0 : index
    %24 = vector.load %arg8[%c0_17, %c0_18] : memref<128x128xbf16, #tpu.memory_space<vmem>>, vector<128x128xbf16>
    %cst_19 = arith.constant dense<0.000000e+00> : vector<8x128xf32>
    %25 = tpu.matmul %23, %24, %cst_19 {dimension_numbers = #tpu.dot_dimension_numbers<[1], [0], [0], [1], [0, 0, 1, 1], [], []>} : vector<8x128xbf16>, vector<128x128xbf16>, vector<8x128xf32> -> vector<8x128xf32>
    %26 = vector.extract_strided_slice %3 {offsets = [0, 256], sizes = [8, 128], strides = [1, 1]} : vector<8x384xf32> to vector<8x128xf32>
    %27 = arith.addf %25, %26 : vector<8x128xf32>
    %c0_20 = arith.constant 0 : index
    %c0_21 = arith.constant 0 : index
    %28 = vector.load %arg9[%c0_20, %c0_21] : memref<1x128xf32, #tpu.memory_space<vmem>>, vector<1x128xf32>
    %29 = vector.broadcast %28 : vector<1x128xf32> to vector<8x128xf32>
    %30 = arith.addf %27, %29 : vector<8x128xf32>
    %c0_22 = arith.constant 0 : index
    %c0_23 = arith.constant 0 : index
    %31 = vector.load %arg10[%c0_22, %c0_23] : memref<8x128xf32, #tpu.memory_space<vmem>>, vector<8x128xf32>
    tpu.vector_store %arg10[%c0_22, %c0_23], %30 {strides = array<i32>} : memref<8x128xf32, #tpu.memory_space<vmem>>, vector<8x128xf32>,
    return
  }
  func.func @transform_0(%arg0: i32) -> (i32, i32) {
    %c0_i32 = arith.constant 0 : i32
    %c0_i32_0 = arith.constant 0 : i32
    return %arg0, %c0_i32 : i32, i32
  }
  func.func @transform_1(%arg0: i32) -> (i32, i32) {
    %c0_i32 = arith.constant 0 : i32
    %c0_i32_0 = arith.constant 0 : i32
    return %arg0, %c0_i32 : i32, i32
  }
  func.func @transform_2(%arg0: i32) -> (i32, i32) {
    %c0_i32 = arith.constant 0 : i32
    %c0_i32_0 = arith.constant 0 : i32
    %c0_i32_1 = arith.constant 0 : i32
    return %c0_i32, %c0_i32_0 : i32, i32
  }
  func.func @transform_3(%arg0: i32) -> (i32, i32) {
    %c0_i32 = arith.constant 0 : i32
    %c0_i32_0 = arith.constant 0 : i32
    %c0_i32_1 = arith.constant 0 : i32
    return %c0_i32, %c0_i32_0 : i32, i32
  }
  func.func @transform_4(%arg0: i32) -> (i32, i32) {
    %c0_i32 = arith.constant 0 : i32
    %c0_i32_0 = arith.constant 0 : i32
    %c0_i32_1 = arith.constant 0 : i32
    return %c0_i32, %c0_i32_0 : i32, i32
  }
  func.func @transform_5(%arg0: i32) -> (i32, i32) {
    %c0_i32 = arith.constant 0 : i32
    %c0_i32_0 = arith.constant 0 : i32
    %c0_i32_1 = arith.constant 0 : i32
    return %c0_i32, %c0_i32_0 : i32, i32
  }
  func.func @transform_6(%arg0: i32) -> (i32, i32) {
    %c0_i32 = arith.constant 0 : i32
    %c0_i32_0 = arith.constant 0 : i32
    %c0_i32_1 = arith.constant 0 : i32
    return %c0_i32, %c0_i32_0 : i32, i32
  }
  func.func @transform_7(%arg0: i32) -> (i32, i32) {
    %c0_i32 = arith.constant 0 : i32
    %c0_i32_0 = arith.constant 0 : i32
    %c0_i32_1 = arith.constant 0 : i32
    return %c0_i32, %c0_i32_0 : i32, i32
  }
  func.func @transform_8(%arg0: i32) -> (i32, i32) {
    %c0_i32 = arith.constant 0 : i32
    %c0_i32_0 = arith.constant 0 : i32
    %c0_i32_1 = arith.constant 0 : i32
    return %c0_i32, %c0_i32_0 : i32, i32
  }
  func.func @transform_9(%arg0: i32) -> (i32, i32) {
    %c0_i32 = arith.constant 0 : i32
    %c0_i32_0 = arith.constant 0 : i32
    return %arg0, %c0_i32 : i32, i32
  }
}

</mosaic_0001>

<bundles_post_ra>
// kernel: tpu_custom_call.1
= control target key start
LH: loop header
LB: loop body
LE: loop exit
PB: predicated region body
PF: predicated region fallthrough
CT: control target
= control target key end

     0   :  { %14 = vsyncpa [#allocation3], 0  ;;  %s945_s0 = inlined_call_operand.hbm [shape: bf16[8,32], index: 0, kind: input, shape index: {}]   ;;  %s946_s1 = inlined_call_operand.hbm [shape: bf16[8,16], index: 1, kind: input, shape index: {}]   ;;  %s947_s2 = inlined_call_operand.hbm [shape: bf16[32,128], index: 2, kind: input, shape index: {}]   ;;  %s948_s3 = inlined_call_operand.vmem [shape: f32[1,128], index: 3, kind: input, shape index: {}]   ;;  %s949_s4 = inlined_call_operand.hbm [shape: bf16[16,384], index: 4, kind: input, shape index: {}]   ;;  %s950_s5 = inlined_call_operand.hbm [shape: bf16[128,128], index: 5, kind: input, shape index: {}]   ;;  %s951_s6 = inlined_call_operand.vmem [shape: f32[1,128], index: 6, kind: input, shape index: {}]   ;;  %s952_s7 = inlined_call_operand.hbm [shape: bf16[128,128], index: 7, kind: input, shape index: {}]   ;;  %s953_s8 = inlined_call_operand.vmem [shape: f32[1,128], index: 8, kind: input, shape index: {}]   ;;  %s954_s9 = inlined_call_operand.hbm [shape: f32[8,128], index: 9, kind: output, shape index: {}]  }
   0x1   :  { %15 = vsyncpa [#allocation6], 0 }
   0x2   :  { %16 = vsyncpa [#allocation9], 0 }
   0x3   :  { %17 = vsyncpa [#allocation12], 0 }
   0x4   :  { %18 = vsyncpa [#allocation4], 0  ;;  %s824_s30 = smov [#allocation5]   ;;  %s825_s11 = smov [#allocation8]  }
   0x5   :  { %s35_s10 = sshll.u32 %s824_s30, 4  ;;  %s58_s12 = sshll.u32 %s825_s11, 4  ;;  %s36_s10 = int_to_ptr.vmem [resolvable:$true] %s35_s10  ;;  %s59_s12 = int_to_ptr.vmem [resolvable:$true] %s58_s12 }
   0x6   :  { %s682_s13 = scalar_lea.vmem %s36_s10, 64  ;;  %p687_p1 = scmp.lt.s32.totalorder %s36_s10, %s36_s10 }
   0x7   :  { %p683_p0 = scmp.ne.s32.totalorder %s36_s10, %s682_s13  ;;  %p688_p2 = scmp.lt.s32.totalorder %s682_s13, %s682_s13 }
   0x9   :  { %p689_p3 = por %p688_p2, %p687_p1 }
   0xb   :  { %p690_p4 = pnand %p689_p3, %p683_p0 }
   0xd   :  { %693 = shalt.err (!%p690_p4)
}
   0xe   :  { %38 = dma.hbm_to_vmem [thread:$0]  %s946_s1, 64, %s36_s10, [#allocation6]  }
   0xf   :  { %s702_s16 = scalar_lea.vmem %s59_s12, 384  ;;  %p707_p6 = scmp.lt.s32.totalorder %s59_s12, %s59_s12 }
  0x10   :  { %p703_p5 = scmp.ne.s32.totalorder %s59_s12, %s702_s16  ;;  %p708_p7 = scmp.lt.s32.totalorder %s702_s16, %s702_s16 }
  0x12   :  { %p709_p8 = por %p708_p7, %p707_p6 }
  0x14   :  { %p710_p9 = pnand %p709_p8, %p703_p5 }
  0x16   :  { %713 = shalt.err (!%p710_p9)
}
  0x17   :  { %s826_s17 = smov 192   ;;  %s827_s18 = smov 12  }
  0x18   :  { %64 = dma.hbm_to_vmem [thread:$0]  %s949_s4, 384, %s59_s12, [#allocation9], %s826_s17, %s826_s17, %s827_s18  }
  0x19   :  { %s828_s21 = smov [#allocation2]   ;;  %s829_s23 = smov [#allocation7]  }
  0x1a   :  { %s25_s22 = sshll.u32 %s828_s21, 4  ;;  %s44_s24 = sshll.u32 %s829_s23, 4  ;;  %s26_s22 = int_to_ptr.vmem [resolvable:$true] %s25_s22  ;;  %s45_s24 = int_to_ptr.vmem [resolvable:$true] %s44_s24 }
  0x1b   :  { %s722_s1 = scalar_lea.vmem %s26_s22, 64  ;;  %p727_p11 = scmp.lt.s32.totalorder %s26_s22, %s26_s22 }
  0x1c   :  { %p723_p10 = scmp.ne.s32.totalorder %s26_s22, %s722_s1  ;;  %p728_p12 = scmp.lt.s32.totalorder %s722_s1, %s722_s1 }
  0x1e   :  { %p729_p13 = por %p728_p12, %p727_p11 }
  0x20   :  { %p730_p0 = pnand %p729_p13, %p723_p10 }
  0x22   :  { %733 = shalt.err (!%p730_p0)
}
  0x23   :  { %28 = dma.hbm_to_vmem [thread:$0]  %s945_s0, 64, %s26_s22, [#allocation3]  }
  0x24   :  { %s742_s27 = scalar_lea.vmem %s45_s24, 256  ;;  %p747_p2 = scmp.lt.s32.totalorder %s45_s24, %s45_s24 }
  0x25   :  { %p743_p1 = scmp.ne.s32.totalorder %s45_s24, %s742_s27  ;;  %p748_p3 = scmp.lt.s32.totalorder %s742_s27, %s742_s27 }
  0x27   :  { %p749_p4 = por %p748_p3, %p747_p2 }
  0x29   :  { %p750_p5 = pnand %p749_p4, %p743_p1 }
  0x2b   :  { %753 = shalt.err (!%p750_p5)
}
  0x2c   :  { %s830_s4 = smov 64   ;;  %s831_s28 = smov 4  }
  0x2d   :  { %50 = dma.hbm_to_vmem [thread:$0]  %s947_s2, 256, %s45_s24, [#allocation6], %s830_s4, %s830_s4, %s831_s28  }
  0x2e   :  { %s832_s10 = smov [#allocation10]   ;;  %s833_s12 = smov [#allocation11]  }
  0x2f   :  { %s70_s11 = sshll.u32 %s832_s10, 4  ;;  %s84_s13 = sshll.u32 %s833_s12, 4  ;;  %s71_s11 = int_to_ptr.vmem [resolvable:$true] %s70_s11  ;;  %s85_s13 = int_to_ptr.vmem [resolvable:$true] %s84_s13 }
  0x30   :  { %s762_s0 = scalar_lea.vmem %s71_s11, 1024  ;;  %p767_p7 = scmp.lt.s32.totalorder %s71_s11, %s71_s11 }
  0x31   :  { %p763_p6 = scmp.ne.s32.totalorder %s71_s11, %s762_s0  ;;  %p768_p8 = scmp.lt.s32.totalorder %s762_s0, %s762_s0 }
  0x33   :  { %p769_p9 = por %p768_p8, %p767_p7 }
  0x35   :  { %p770_p10 = pnand %p769_p9, %p763_p6 }
  0x37   :  { %773 = shalt.err (!%p770_p10)
}
  0x38   :  { %76 = dma.hbm_to_vmem [thread:$0]  %s950_s5, 1024, %s71_s11, [#allocation9], %s830_s4, %s830_s4, %s831_s28  }
  0x39   :  { %s782_s16 = scalar_lea.vmem %s85_s13, 1024  ;;  %p787_p12 = scmp.lt.s32.totalorder %s85_s13, %s85_s13 }
  0x3a   :  { %p783_p11 = scmp.ne.s32.totalorder %s85_s13, %s782_s16  ;;  %p788_p13 = scmp.lt.s32.totalorder %s782_s16, %s782_s16 }
  0x3c   :  { %p789_p0 = por %p788_p13, %p787_p12 }
  0x3e   :  { %p790_p1 = pnand %p789_p0, %p783_p11 }
  0x40   :  { %793 = shalt.err (!%p790_p1)
}
  0x41   :  { %90 = dma.hbm_to_vmem [thread:$0]  %s952_s7, 1024, %s85_s13, [#allocation12], %s830_s4, %s830_s4, %s831_s28  }
  0x42   :  { %814 = dma.done.wait [#allocation3], 64  }
  0x43   :  { %815 = vsyncadd [#allocation3], 4294967232 }
  0x44   :  { %816 = dma.done.wait [#allocation6], 320  }
  0x45   :  { %817 = vsyncadd [#allocation6], 4294966976 }
  0x46   :  { %818 = dma.done.wait [#allocation9], 1408  }
  0x47   :  { %819 = vsyncadd [#allocation9], 4294965888 }
  0x48   :  { %820 = dma.done.wait [#allocation12], 1024  }
  0x49   :  { %821 = vsyncadd [#allocation12], 4294966272  ;;  %v834_v0 = vmov 0   ;;  %v835_v1 = vmov 0.0   ;;  %vm836_vm0 = vmmov 0   ;;  %vm134_vm1 = vcmask 130048  }
  0x4a   :  { %170 = vmatprep.mubr.bf16.mxu0 %v834_v0  ;;  %584 = vmatprep.subr.bf16.mxu1 %v835_v1  ;;  %v652_v2 = vld [vmem:[#allocation8 + $0x4] ss:$12 sps:$4 sm:$0xff]   ;;  %v654_v3 = vld [vmem:[#allocation8] ss:$12 sps:$4 sm:$0xff]   ;;  %v655_v5 = vld [vmem:[#allocation7 + $0x8] sm:$0xff]   ;;  %vm235_vm2 = vcmask 261120  }
  0x4b   :  { %586 = vmatprep.mubr.msk.bf16.mxu1 %vm836_vm0, %v835_v1  ;;  %152 = vmatprep.subr.bf16.mxu0 %v652_v2  ;;  %v113_v4 = vld [vmem:[#allocation5] sm:$0xf]  ;;  %v657_v6 = vld [vmem:[#allocation8 + $0x8] ss:$12 sps:$4 sm:$0xff]   ;;  %v660_v11 = vld [vmem:[#allocation10 + $0x28] sm:$0xff]   ;;  %s837_s21 = smov [#allocation13]  }
  0x4c   :  { %153 = vmatpush1.bf16.msra.mxu0 %v654_v3  ;;  %585 = vmatpush3.bf16.msra.mxu1 %v657_v6  ;;  %v658_v7 = vld [vmem:[#allocation10 + $0x38] sm:$0xff]   ;;  %v659_v9 = vld [vmem:[#allocation10 + $0x30] sm:$0xff]   ;;  %v661_v12 = vld [vmem:[#allocation10 + $0x20] sm:$0xff]   ;;  %s522_s22 = sshll.u32 %s837_s21, 4  ;;  %s523_s22 = int_to_ptr.vmem [resolvable:$true] %s522_s22 }
  0x4d   :  { %590 = vmatprep.subr.bf16.mxu0 %v835_v1  ;;  %v656_v8 = vld [vmem:[#allocation7] sm:$0xff]   ;;  %598 = vmatprep.subr.bf16.mxu1 %v835_v1  ;;  %v112_v10 = vld [vmem:[#allocation2] sm:$0xf]  ;;  %v664_v15 = vld [vmem:[#allocation10 + $0x8] sm:$0xff]   ;;  %p799_p3 = scmp.lt.s32.totalorder %s523_s22, %s523_s22 }
  0x4e   :  { %v662_v13 = vld [vmem:[#allocation10 + $0x18] sm:$0xff]   ;;  %v663_v14 = vld [vmem:[#allocation10 + $0x10] sm:$0xff]   ;;  %v665_v16 = vld [vmem:[#allocation10] sm:$0xff]  }
  0x4f   :  { %537 = vmatmul.mubr.msk.bf16.vlgmr.msra.gmra.mxu0 %vm134_vm1, %v113_v4  ;;  %587 = vmatmul.mubr.msk.bf16.vlgmr.msra.gmra.mxu1 %vm134_vm1, %v113_v4  ;;  %v666_v17 = vld [vmem:[#allocation11 + $0x38] sm:$0xff]   ;;  %v667_v18 = vld [vmem:[#allocation11 + $0x30] sm:$0xff]   ;;  %v668_v19 = vld [vmem:[#allocation11 + $0x28] sm:$0xff]  }
  0x50   :  { %591 = vmatpush3.bf16.msra.mxu0 %v655_v5  ;;  %594 = vmatprep.mubr.msk.bf16.mxu0 %vm836_vm0, %v835_v1  ;;  %v669_v20 = vld [vmem:[#allocation11 + $0x20] sm:$0xff]   ;;  %v670_v21 = vld [vmem:[#allocation11 + $0x18] sm:$0xff]   ;;  %v671_v22 = vld [vmem:[#allocation11 + $0x10] sm:$0xff]  }
  0x51   :  { %592 = vmatprep.subr.bf16.mxu0 %v835_v1  ;;  %599 = vmatpush3.bf16.msra.mxu1 %v658_v7  ;;  %v542_v31 = vld [vmem:[%s948_s3] ss:$0 sm:$0xff]  ;;  %v672_v40 = vld [vmem:[#allocation11 + $0x8] sm:$0xff]   ;;  %v673_v41 = vld [vmem:[#allocation11] sm:$0xff]  }
  0x52   :  { %614 = vmatprep.mubr.msk.bf16.mxu1 %vm836_vm0, %v835_v1  ;;  %600 = vmatprep.subr.bf16.mxu1 %v835_v1  ;;  %v551_v43 = vld [vmem:[%s951_s6] ss:$0 sm:$0xff]  ;;  %s794_s6 = scalar_lea.vmem %s523_s22, 128 }
  0x53   :  { %v560_v52 = vld [vmem:[%s953_s8] ss:$0 sm:$0xff]  ;;  %p795_p2 = scmp.ne.s32.totalorder %s523_s22, %s794_s6  ;;  %p800_p4 = scmp.lt.s32.totalorder %s794_s6, %s794_s6 }
  0x54   :  { %593 = vmatpush3.bf16.msra.mxu0 %v656_v8 }
  0x55   :  { %618 = vmatprep.subr.bf16.mxu0 %v835_v1  ;;  %601 = vmatpush3.bf16.msra.mxu1 %v659_v9  ;;  %p801_p5 = por %p800_p4, %p799_p3 }
  0x56   :  { %602 = vmatprep.subr.bf16.mxu1 %v835_v1 }
  0x57   :  { %595 = vmatmul.mubr.msk.bf16.vlgmr.msra.gmra.mxu0 %vm235_vm2, %v112_v10  ;;  %p802_p6 = pnand %p801_p5, %p795_p2 }
  0x58   :  { %634 = vmatprep.mubr.msk.bf16.mxu0 %vm836_vm0, %v835_v1  ;;  %619 = vmatpush3.bf16.msra.mxu0 %v666_v17 }
  0x59   :  { %603 = vmatpush3.bf16.msra.mxu1 %v660_v11  ;;  %620 = vmatprep.subr.bf16.mxu0 %v835_v1 }
  0x5a   :  { %604 = vmatprep.subr.bf16.mxu1 %v835_v1 }
  0x5c   :  { %621 = vmatpush3.bf16.msra.mxu0 %v667_v18 }
  0x5d   :  { %605 = vmatpush3.bf16.msra.mxu1 %v661_v12  ;;  %622 = vmatprep.subr.bf16.mxu0 %v835_v1 }
  0x5e   :  { %606 = vmatprep.subr.bf16.mxu1 %v835_v1 }
  0x60   :  { %623 = vmatpush3.bf16.msra.mxu0 %v668_v19 }
  0x61   :  { %607 = vmatpush3.bf16.msra.mxu1 %v662_v13  ;;  %624 = vmatprep.subr.bf16.mxu0 %v835_v1 }
  0x62   :  { %608 = vmatprep.subr.bf16.mxu1 %v835_v1 }
  0x64   :  { %625 = vmatpush3.bf16.msra.mxu0 %v669_v20 }
  0x65   :  { %609 = vmatpush3.bf16.msra.mxu1 %v663_v14  ;;  %626 = vmatprep.subr.bf16.mxu0 %v835_v1 }
  0x66   :  { %610 = vmatprep.subr.bf16.mxu1 %v835_v1 }
  0x68   :  { %627 = vmatpush3.bf16.msra.mxu0 %v670_v21 }
  0x69   :  { %611 = vmatpush3.bf16.msra.mxu1 %v664_v15  ;;  %628 = vmatprep.subr.bf16.mxu0 %v835_v1 }
  0x6a   :  { %612 = vmatprep.subr.bf16.mxu1 %v835_v1 }
  0x6c   :  { %629 = vmatpush3.bf16.msra.mxu0 %v671_v22 }
  0x6d   :  { %613 = vmatpush3.bf16.msra.mxu1 %v665_v16  ;;  %630 = vmatprep.subr.bf16.mxu0 %v835_v1 }
  0x70   :  { %631 = vmatpush3.bf16.msra.mxu0 %v672_v40 }
  0x71   :  { %632 = vmatprep.subr.bf16.mxu0 %v835_v1 }
  0x74   :  { %633 = vmatpush3.bf16.msra.mxu0 %v673_v41 }
 0x10f   :  { %v172_v23 = vpop.f32.mrf.mxu0  ;;  %v213_v25 = vpop.f32.mrf.mxu1 }
 0x111   :  { %v174_v24 = vpop.f32.mrf.mxu0  ;;  %v588_v27 = vpop.f32.mrf.mxu1 }
 0x113   :  { %v176_v26 = vpop.f32.mrf.mxu0  ;;  %v216_v29 = vpop.f32.mrf.mxu1 }
 0x115   :  { %v177_v28 = vpop.f32.mrf.mxu0  ;;  %v589_v33 = vpop.f32.mrf.mxu1 }
 0x117   :  { %v273_v30 = vpop.f32.mrf.mxu0 }
 0x118   :  { %v274_v32 = vadd.f32 %v273_v30, %v172_v23 }
 0x119   :  { %v596_v34 = vpop.f32.mrf.mxu0 }
 0x11a   :  { %v286_v35 = vadd.f32 %v542_v31, %v274_v32 }
 0x11b   :  { %v276_v36 = vpop.f32.mrf.mxu0 }
 0x11c   :  { %v287_v37 = vmax.f32 %v286_v35, 0.0 }
 0x11d   :  { %v597_v38 = vpop.f32.mrf.mxu0 }
 0x11e   :  { %v288_v39 = vpack.c.bf16 %v287_v37, %v287_v37 }
 0x120   :  { %615 = vmatmul.mubr.bf16.vlgmr.msra.gmra.mxu1 %v288_v39 }
 0x1e0   :  { %v387_v42 = vpop.f32.mrf.mxu1 }
 0x1e1   :  { %v388_v44 = vadd.f32 %v387_v42, %v174_v24 }
 0x1e2   :  { %v616_v45 = vpop.f32.mrf.mxu1 }
 0x1e3   :  { %v400_v46 = vadd.f32 %v551_v43, %v388_v44 }
 0x1e4   :  { %v390_v47 = vpop.f32.mrf.mxu1 }
 0x1e5   :  { %v401_v48 = vmax.f32 %v400_v46, 0.0 }
 0x1e6   :  { %v617_v49 = vpop.f32.mrf.mxu1 }
 0x1e7   :  { %v402_v50 = vpack.c.bf16 %v401_v48, %v401_v48 }
 0x1e9   :  { %635 = vmatmul.mubr.bf16.vlgmr.msra.gmra.mxu0 %v402_v50 }
 0x2a9   :  { %v501_v51 = vpop.f32.mrf.mxu0 }
 0x2aa   :  { %v502_v53 = vadd.f32 %v501_v51, %v213_v25 }
 0x2ab   :  { %v636_v54 = vpop.f32.mrf.mxu0 }
 0x2ac   :  { %v514_v55 = vadd.f32 %v560_v52, %v502_v53 }
 0x2ad   :  { %v504_v56 = vpop.f32.mrf.mxu0 }
 0x2ae   :  { %515 = vst [vmem:[#allocation13] sm:$0xff] %v514_v55 }
 0x2af   :  { %v637_v57 = vpop.f32.mrf.mxu0 }
 0x2b0   :  { %805 = shalt.err (!%p802_p6)
}
 0x2b1   :  { %525 = dma.vmem_to_hbm [thread:$0]  %s523_s22, 128, %s954_s9, [#allocation4]  }
 0x2b2   :  { %822 = dma.done.wait [#allocation4], 128  }
 0x2b3   :  { %823 = vsyncadd [#allocation4], 4294967168 }
 0x2b4   :  { %529 = vsyncpa [#allocation3], 1 }
 0x2b5   :  { %530 = vsyncpa [#allocation6], 1 }
 0x2b6   :  { %531 = vsyncpa [#allocation9], 1 }
 0x2b7   :  { %532 = vsyncpa [#allocation12], 1 }
 0x2b8   :  { %533 = vsyncpa [#allocation4], 1 }

</bundles_post_ra>
